<compile_context>
chip_gen: v7x
topology: tpu7x:2x2x1
jax: 0.10.0
libtpu: 0.0.40
codegen_flags: <defaults>
</compile_context>

<pallas_src>
import jax
import jax.numpy as jnp
from jax.experimental import pallas as pl
from jax.experimental.pallas import tpu as pltpu


LANE = 128


def _round_up(n, m):
    return ((n + m - 1) // m) * m


# ----------------------------- Pallas kernel --------------------------------
def _vae_fwd_kernel(
    x_ref,       # (TB, Din_p)  f32
    eps_ref,     # (TB, L_p)    f32, uniform [0,1) (zero in padded lanes)
    ew1_ref,     # (Din_p, H_p) bf16
    eb1_ref,     # (1, H_p)     f32
    ewmu_ref,    # (H_p, L_p)   bf16
    ebmu_ref,    # (1, L_p)     f32
    ewlv_ref,    # (H_p, L_p)   bf16
    eblv_ref,    # (1, L_p)     f32
    dw1_ref,     # (L_p, H_p)   bf16
    db1_ref,     # (1, H_p)     f32
    dw2_ref,     # (H_p, Din_p) bf16
    db2_ref,     # (1, Din_p)   f32
    recon_ref,   # (TB, Din_p)  f32 out
    mu_ref,      # (TB, L_p)    f32 out
    logvar_ref,  # (TB, L_p)    f32 out
):
    bf16 = jnp.bfloat16

    # ---- encoder ----
    xb = x_ref[...].astype(bf16)
    h = jnp.dot(xb, ew1_ref[...], preferred_element_type=jnp.float32) + eb1_ref[...]
    h = jnp.maximum(h, 0.2 * h)                     # LeakyReLU(0.2)
    hb = h.astype(bf16)

    mu = jnp.dot(hb, ewmu_ref[...], preferred_element_type=jnp.float32) + ebmu_ref[...]
    logvar = jnp.dot(hb, ewlv_ref[...], preferred_element_type=jnp.float32) + eblv_ref[...]

    # ---- reparametrize: z = mu + eps * exp(0.5 * logvar), eps ~ U[0,1) ----
    std = jnp.exp(0.5 * logvar)
    z = mu + eps_ref[...] * std

    # ---- decoder ----
    zb = z.astype(bf16)
    d = jnp.dot(zb, dw1_ref[...], preferred_element_type=jnp.float32) + db1_ref[...]
    d = jnp.maximum(d, 0.0)                         # ReLU
    dbq = d.astype(bf16)
    logits = jnp.dot(dbq, dw2_ref[...], preferred_element_type=jnp.float32) + db2_ref[...]

    # Sigmoid via EUP exp + approximate reciprocal (keeps divide off the VALU).
    e = jnp.exp(-logits)
    recon = pl.reciprocal(1.0 + e, approx=True)

    recon_ref[...] = recon.astype(recon_ref.dtype)
    mu_ref[...] = mu.astype(mu_ref.dtype)
    logvar_ref[...] = logvar.astype(logvar_ref.dtype)


# ------------------------------ wrapper --------------------------------------
def vae_forward(x, padded, eps, *, input_size, latent_dim, block_b=128):
    """x: (B, input_size) f32; padded: lane-padded params; eps: (B, latent_dim) f32."""
    B = x.shape[0]
    Din_p, H_p = padded["ew1"].shape
    L_p = padded["ew_mu"].shape[1]

    TB = int(min(block_b, _round_up(max(B, 8), 8)))
    Bp = _round_up(B, TB)

    # Zero-pad batch + feature/latent lanes (zeros are exact no-ops through the net).
    xp = jnp.zeros((Bp, Din_p), jnp.float32).at[:B, :input_size].set(x)
    epsp = jnp.zeros((Bp, L_p), jnp.float32).at[:B, :latent_dim].set(eps)

    grid = (Bp // TB,)

    def tiled(feat):                       # per-step batch tile
        return pl.BlockSpec((TB, feat), lambda i: (i, 0))

    def resident(shape):                   # constant index_map -> stays in VMEM
        return pl.BlockSpec(shape, lambda i: (0, 0))

    in_specs = [
        tiled(Din_p),                      # x
        tiled(L_p),                        # eps
        resident((Din_p, H_p)),            # ew1
        resident((1, H_p)),                # eb1
        resident((H_p, L_p)),              # ew_mu
        resident((1, L_p)),                # eb_mu
        resident((H_p, L_p)),              # ew_lv
        resident((1, L_p)),                # eb_lv
        resident((L_p, H_p)),              # dw1
        resident((1, H_p)),                # db1
        resident((H_p, Din_p)),            # dw2
        resident((1, Din_p)),              # db2
    ]
    out_specs = (tiled(Din_p), tiled(L_p), tiled(L_p))
    out_shape = (
        jax.ShapeDtypeStruct((Bp, Din_p), jnp.float32),   # recon (padded)
        jax.ShapeDtypeStruct((Bp, L_p), jnp.float32),     # mu    (padded)
        jax.ShapeDtypeStruct((Bp, L_p), jnp.float32),     # logvar(padded)
    )

    # VMEM budget: double-buffered activation tiles + resident bf16 weights.
    act_bytes = 4 * TB * (2 * Din_p + 3 * L_p)                   # x+recon, eps+mu+logvar
    w_bytes = (2 * (Din_p * H_p + 2 * H_p * L_p + L_p * H_p + H_p * Din_p)
               + 4 * (2 * H_p + 2 * L_p + H_p + Din_p))
    vmem_limit = min(max(2 * (act_bytes + w_bytes) + (8 << 20), 32 << 20), 64 << 20)

    recon_p, mu_p, lv_p = pl.pallas_call(
        _vae_fwd_kernel,
        out_shape=out_shape,
        grid=grid,
        in_specs=in_specs,
        out_specs=out_specs,
        compiler_params=pltpu.CompilerParams(
            dimension_semantics=("parallel",),
            vmem_limit_bytes=int(vmem_limit),
        ),
    )(xp, epsp,
      padded["ew1"], padded["eb1"],
      padded["ew_mu"], padded["eb_mu"],
      padded["ew_lv"], padded["eb_lv"],
      padded["dw1"], padded["db1"],
      padded["dw2"], padded["db2"])

    return (recon_p[:B, :input_size],
            mu_p[:B, :latent_dim],
            lv_p[:B, :latent_dim])


# ----------------------- params: init + lane padding --------------------------
def init_params(key, input_size, h_dim, latent_dim):
    """PyTorch-style uniform(-1/sqrt(fan_in), ...) init, stored (in, out), f32."""
    ks = jax.random.split(key, 8)

    def lin(kw, kb, fan_in, fan_out):
        bound = 1.0 / jnp.sqrt(fan_in)
        w = jax.random.uniform(kw, (fan_in, fan_out), jnp.float32, -bound, bound)
        b = jax.random.uniform(kb, (1, fan_out), jnp.float32, -bound, bound)
        return w, b

    ew1, eb1 = lin(ks[0], ks[1], input_size, h_dim)
    ew2, eb2 = lin(ks[2], ks[3], h_dim, 2 * latent_dim)
    dw1, db1 = lin(ks[4], ks[5], latent_dim, h_dim)
    dw2, db2 = lin(ks[6], ks[7], h_dim, input_size)
    return dict(ew1=ew1, eb1=eb1, ew2=ew2, eb2=eb2,
                dw1=dw1, db1=db1, dw2=dw2, db2=db2)


def prepare_padded_params(p, input_size, h_dim, latent_dim):
    """Zero-pad every dim to 128 lanes, split the encoder head into mu / logvar,
    store weights as bf16 (halves DMA + VMEM), keep biases f32."""
    Din_p = _round_up(input_size, LANE)
    H_p = _round_up(h_dim, LANE)
    L_p = _round_up(latent_dim, LANE)

    def pad2(a, r, c, dtype):
        out = jnp.zeros((r, c), dtype)
        return out.at[: a.shape[0], : a.shape[1]].set(a.astype(dtype))

    bf16, f32 = jnp.bfloat16, jnp.float32
    L = latent_dim
    return dict(
        ew1=pad2(p["ew1"], Din_p, H_p, bf16),
        eb1=pad2(p["eb1"], 1, H_p, f32),
        ew_mu=pad2(p["ew2"][:, :L], H_p, L_p, bf16),
        eb_mu=pad2(p["eb2"][:, :L], 1, L_p, f32),
        ew_lv=pad2(p["ew2"][:, L:], H_p, L_p, bf16),
        eb_lv=pad2(p["eb2"][:, L:], 1, L_p, f32),
        dw1=pad2(p["dw1"], L_p, H_p, bf16),
        db1=pad2(p["db1"], 1, H_p, f32),
        dw2=pad2(p["dw2"], H_p, Din_p, bf16),
        db2=pad2(p["db2"], 1, Din_p, f32),
    )


# ------------------------------ references ------------------------------------
def vae_forward_ref_f32(x, p, eps):
    """Pure-f32 reference (matches the PyTorch module exactly)."""
    h = jnp.dot(x, p["ew1"]) + p["eb1"]
    h = jnp.where(h > 0, h, 0.2 * h)
    enc = jnp.dot(h, p["ew2"]) + p["eb2"]
    L = eps.shape[1]
    mu, logvar = enc[:, :L], enc[:, L:]
    z = mu + eps * jnp.exp(0.5 * logvar)
    d = jnp.maximum(jnp.dot(z, p["dw1"]) + p["db1"], 0.0)
    recon = jax.nn.sigmoid(jnp.dot(d, p["dw2"]) + p["db2"])
    return recon, mu, logvar


def vae_forward_ref_bf16(x, p, eps):
    """Reference with the same bf16 MXU operands / f32 accumulation as the kernel."""
    bf = jnp.bfloat16

    def mm(a, w):
        return jnp.dot(a.astype(bf), w.astype(bf), preferred_element_type=jnp.float32)

    h = mm(x, p["ew1"]) + p["eb1"]
    h = jnp.maximum(h, 0.2 * h)
    L = eps.shape[1]
    mu = mm(h, p["ew2"][:, :L]) + p["eb2"][:, :L]
    logvar = mm(h, p["ew2"][:, L:]) + p["eb2"][:, L:]
    z = mu + eps * jnp.exp(0.5 * logvar)
    d = jnp.maximum(mm(z, p["dw1"]) + p["db1"], 0.0)
    recon = jax.nn.sigmoid(mm(d, p["dw2"]) + p["db2"])
    return recon, mu, logvar


# -------------------------------- main ----------------------------------------
if __name__ == "__main__":
    # module defaults: latent_dim=2, input_size=10, h_dim=5
    INPUT_SIZE, H_DIM, LATENT = 10, 5, 2
    B = 512          # 128 rows per grid step -> grid=(4,)

    key = jax.random.PRNGKey(0)
    k_params, k_x, k_eps = jax.random.split(key, 3)

    params = init_params(k_params, INPUT_SIZE, H_DIM, LATENT)
    padded = prepare_padded_params(params, INPUT_SIZE, H_DIM, LATENT)

    # forward() does x.view(-1, input_size); emulate with a pre-flattened input
    x = jax.random.uniform(k_x, (B, INPUT_SIZE), jnp.float32)
    # torch.rand_like -> uniform [0, 1); generated outside for deterministic checking
    eps = jax.random.uniform(k_eps, (B, LATENT), jnp.float32)

    fwd = jax.jit(vae_forward,
                  static_argnames=("input_size", "latent_dim", "block_b"))
    recon, mu, logvar = fwd(x, padded, eps,
                            input_size=INPUT_SIZE, latent_dim=LATENT, block_b=128)
    jax.block_until_ready((recon, mu, logvar))

    # 1) matched-precision reference (same bf16 operands; exact sigmoid)
    r_m, mu_m, lv_m = vae_forward_ref_bf16(x, params, eps)
    assert jnp.allclose(mu, mu_m, atol=5e-3), float(jnp.max(jnp.abs(mu - mu_m)))
    assert jnp.allclose(logvar, lv_m, atol=5e-3), float(jnp.max(jnp.abs(logvar - lv_m)))
    assert jnp.allclose(recon, r_m, atol=2e-2), float(jnp.max(jnp.abs(recon - r_m)))

    # 2) full-f32 reference (bounds total bf16 + approx-sigmoid drift)
    r_f, mu_f, lv_f = vae_forward_ref_f32(x, params, eps)
    assert jnp.allclose(mu, mu_f, atol=1e-1)
    assert jnp.allclose(logvar, lv_f, atol=1e-1)
    assert jnp.allclose(recon, r_f, atol=1e-1)

    print("KERNEL_OK")
</pallas_src>

<mosaic_0001>
module attributes {stable_mosaic.version = 11 : i64} {
  func.func @_vae_fwd_kernel(%arg0: i32, %arg1: memref<128x128xf32, #tpu.memory_space<vmem>>, %arg2: memref<128x128xf32, #tpu.memory_space<vmem>>, %arg3: memref<128x128xbf16, #tpu.memory_space<vmem>>, %arg4: memref<1x128xf32, #tpu.memory_space<vmem>>, %arg5: memref<128x128xbf16, #tpu.memory_space<vmem>>, %arg6: memref<1x128xf32, #tpu.memory_space<vmem>>, %arg7: memref<128x128xbf16, #tpu.memory_space<vmem>>, %arg8: memref<1x128xf32, #tpu.memory_space<vmem>>, %arg9: memref<128x128xbf16, #tpu.memory_space<vmem>>, %arg10: memref<1x128xf32, #tpu.memory_space<vmem>>, %arg11: memref<128x128xbf16, #tpu.memory_space<vmem>>, %arg12: memref<1x128xf32, #tpu.memory_space<vmem>>, %arg13: memref<128x128xf32, #tpu.memory_space<vmem>>, %arg14: memref<128x128xf32, #tpu.memory_space<vmem>>, %arg15: memref<128x128xf32, #tpu.memory_space<vmem>>) attributes {dimension_semantics = [#tpu.dimension_semantics<parallel>], iteration_bounds = array<i64: 4>, scalar_prefetch = 0 : i64, scratch_operands = 0 : i64, tpu.core_type = #tpu.core_type<tc>, window_params = [{transform_indices = @transform_0, window_bounds = array<i64: 128, 128>}, {transform_indices = @transform_1, window_bounds = array<i64: 128, 128>}, {pipeline_mode = #tpu.pipeline_mode<synchronous>, transform_indices = @transform_2, window_bounds = array<i64: 128, 128>}, {pipeline_mode = #tpu.pipeline_mode<synchronous>, transform_indices = @transform_3, window_bounds = array<i64: 1, 128>}, {pipeline_mode = #tpu.pipeline_mode<synchronous>, transform_indices = @transform_4, window_bounds = array<i64: 128, 128>}, {pipeline_mode = #tpu.pipeline_mode<synchronous>, transform_indices = @transform_5, window_bounds = array<i64: 1, 128>}, {pipeline_mode = #tpu.pipeline_mode<synchronous>, transform_indices = @transform_6, window_bounds = array<i64: 128, 128>}, {pipeline_mode = #tpu.pipeline_mode<synchronous>, transform_indices = @transform_7, window_bounds = array<i64: 1, 128>}, {pipeline_mode = #tpu.pipeline_mode<synchronous>, transform_indices = @transform_8, window_bounds = array<i64: 128, 128>}, {pipeline_mode = #tpu.pipeline_mode<synchronous>, transform_indices = @transform_9, window_bounds = array<i64: 1, 128>}, {pipeline_mode = #tpu.pipeline_mode<synchronous>, transform_indices = @transform_10, window_bounds = array<i64: 128, 128>}, {pipeline_mode = #tpu.pipeline_mode<synchronous>, transform_indices = @transform_11, window_bounds = array<i64: 1, 128>}, {transform_indices = @transform_12, window_bounds = array<i64: 128, 128>}, {transform_indices = @transform_13, window_bounds = array<i64: 128, 128>}, {transform_indices = @transform_14, window_bounds = array<i64: 128, 128>}]} {
    %c0 = arith.constant 0 : index
    %c0_0 = arith.constant 0 : index
    %0 = vector.load %arg1[%c0, %c0_0] : memref<128x128xf32, #tpu.memory_space<vmem>>, vector<128x128xf32>
    %1 = arith.truncf %0 : vector<128x128xf32> to vector<128x128xbf16>
    %c0_1 = arith.constant 0 : index
    %c0_2 = arith.constant 0 : index
    %2 = vector.load %arg3[%c0_1, %c0_2] : memref<128x128xbf16, #tpu.memory_space<vmem>>, vector<128x128xbf16>
    %cst = arith.constant dense<0.000000e+00> : vector<128x128xf32>
    %3 = tpu.matmul %1, %2, %cst {dimension_numbers = #tpu.dot_dimension_numbers<[1], [0], [0], [1], [0, 0, 1, 1], [], []>} : vector<128x128xbf16>, vector<128x128xbf16>, vector<128x128xf32> -> vector<128x128xf32>
    %c0_3 = arith.constant 0 : index
    %c0_4 = arith.constant 0 : index
    %4 = vector.load %arg4[%c0_3, %c0_4] : memref<1x128xf32, #tpu.memory_space<vmem>>, vector<1x128xf32>
    %5 = vector.broadcast %4 : vector<1x128xf32> to vector<128x128xf32>
    %6 = arith.addf %3, %5 : vector<128x128xf32>
    %cst_5 = arith.constant 2.000000e-01 : f32
    %7 = vector.broadcast %cst_5 : f32 to vector<128x128xf32>
    %8 = arith.mulf %7, %6 : vector<128x128xf32>
    %9 = arith.maximumf %6, %8 : vector<128x128xf32>
    %10 = arith.truncf %9 : vector<128x128xf32> to vector<128x128xbf16>
    %c0_6 = arith.constant 0 : index
    %c0_7 = arith.constant 0 : index
    %11 = vector.load %arg5[%c0_6, %c0_7] : memref<128x128xbf16, #tpu.memory_space<vmem>>, vector<128x128xbf16>
    %cst_8 = arith.constant dense<0.000000e+00> : vector<128x128xf32>
    %12 = tpu.matmul %10, %11, %cst_8 {dimension_numbers = #tpu.dot_dimension_numbers<[1], [0], [0], [1], [0, 0, 1, 1], [], []>} : vector<128x128xbf16>, vector<128x128xbf16>, vector<128x128xf32> -> vector<128x128xf32>
    %c0_9 = arith.constant 0 : index
    %c0_10 = arith.constant 0 : index
    %13 = vector.load %arg6[%c0_9, %c0_10] : memref<1x128xf32, #tpu.memory_space<vmem>>, vector<1x128xf32>
    %14 = vector.broadcast %13 : vector<1x128xf32> to vector<128x128xf32>
    %15 = arith.addf %12, %14 : vector<128x128xf32>
    %c0_11 = arith.constant 0 : index
    %c0_12 = arith.constant 0 : index
    %16 = vector.load %arg7[%c0_11, %c0_12] : memref<128x128xbf16, #tpu.memory_space<vmem>>, vector<128x128xbf16>
    %cst_13 = arith.constant dense<0.000000e+00> : vector<128x128xf32>
    %17 = tpu.matmul %10, %16, %cst_13 {dimension_numbers = #tpu.dot_dimension_numbers<[1], [0], [0], [1], [0, 0, 1, 1], [], []>} : vector<128x128xbf16>, vector<128x128xbf16>, vector<128x128xf32> -> vector<128x128xf32>
    %c0_14 = arith.constant 0 : index
    %c0_15 = arith.constant 0 : index
    %18 = vector.load %arg8[%c0_14, %c0_15] : memref<1x128xf32, #tpu.memory_space<vmem>>, vector<1x128xf32>
    %19 = vector.broadcast %18 : vector<1x128xf32> to vector<128x128xf32>
    %20 = arith.addf %17, %19 : vector<128x128xf32>
    %cst_16 = arith.constant 5.000000e-01 : f32
    %21 = vector.broadcast %cst_16 : f32 to vector<128x128xf32>
    %22 = arith.mulf %21, %20 : vector<128x128xf32>
    %23 = math.exp %22 : vector<128x128xf32>
    %c0_17 = arith.constant 0 : index
    %c0_18 = arith.constant 0 : index
    %24 = vector.load %arg2[%c0_17, %c0_18] : memref<128x128xf32, #tpu.memory_space<vmem>>, vector<128x128xf32>
    %25 = arith.mulf %24, %23 : vector<128x128xf32>
    %26 = arith.addf %15, %25 : vector<128x128xf32>
    %27 = arith.truncf %26 : vector<128x128xf32> to vector<128x128xbf16>
    %c0_19 = arith.constant 0 : index
    %c0_20 = arith.constant 0 : index
    %28 = vector.load %arg9[%c0_19, %c0_20] : memref<128x128xbf16, #tpu.memory_space<vmem>>, vector<128x128xbf16>
    %cst_21 = arith.constant dense<0.000000e+00> : vector<128x128xf32>
    %29 = tpu.matmul %27, %28, %cst_21 {dimension_numbers = #tpu.dot_dimension_numbers<[1], [0], [0], [1], [0, 0, 1, 1], [], []>} : vector<128x128xbf16>, vector<128x128xbf16>, vector<128x128xf32> -> vector<128x128xf32>
    %c0_22 = arith.constant 0 : index
    %c0_23 = arith.constant 0 : index
    %30 = vector.load %arg10[%c0_22, %c0_23] : memref<1x128xf32, #tpu.memory_space<vmem>>, vector<1x128xf32>
    %31 = vector.broadcast %30 : vector<1x128xf32> to vector<128x128xf32>
    %32 = arith.addf %29, %31 : vector<128x128xf32>
    %cst_24 = arith.constant 0.000000e+00 : f32
    %33 = vector.broadcast %cst_24 : f32 to vector<128x128xf32>
    %34 = arith.maximumf %32, %33 : vector<128x128xf32>
    %35 = arith.truncf %34 : vector<128x128xf32> to vector<128x128xbf16>
    %c0_25 = arith.constant 0 : index
    %c0_26 = arith.constant 0 : index
    %36 = vector.load %arg11[%c0_25, %c0_26] : memref<128x128xbf16, #tpu.memory_space<vmem>>, vector<128x128xbf16>
    %cst_27 = arith.constant dense<0.000000e+00> : vector<128x128xf32>
    %37 = tpu.matmul %35, %36, %cst_27 {dimension_numbers = #tpu.dot_dimension_numbers<[1], [0], [0], [1], [0, 0, 1, 1], [], []>} : vector<128x128xbf16>, vector<128x128xbf16>, vector<128x128xf32> -> vector<128x128xf32>
    %c0_28 = arith.constant 0 : index
    %c0_29 = arith.constant 0 : index
    %38 = vector.load %arg12[%c0_28, %c0_29] : memref<1x128xf32, #tpu.memory_space<vmem>>, vector<1x128xf32>
    %39 = vector.broadcast %38 : vector<1x128xf32> to vector<128x128xf32>
    %40 = arith.addf %37, %39 : vector<128x128xf32>
    %cst_30 = arith.constant 0.000000e+00 : f32
    %41 = vector.broadcast %cst_30 : f32 to vector<128x128xf32>
    %42 = arith.subf %41, %40 : vector<128x128xf32>
    %43 = math.exp %42 : vector<128x128xf32>
    %cst_31 = arith.constant 1.000000e+00 : f32
    %44 = vector.broadcast %cst_31 : f32 to vector<128x128xf32>
    %45 = arith.addf %44, %43 : vector<128x128xf32>
    %46 = tpu.reciprocal %45 {approx = true} : vector<128x128xf32> -> vector<128x128xf32>
    %c0_32 = arith.constant 0 : index
    %c0_33 = arith.constant 0 : index
    %47 = vector.load %arg13[%c0_32, %c0_33] : memref<128x128xf32, #tpu.memory_space<vmem>>, vector<128x128xf32>
    tpu.vector_store %arg13[%c0_32, %c0_33], %46 {strides = array<i32>} : memref<128x128xf32, #tpu.memory_space<vmem>>, vector<128x128xf32>,
    %c0_34 = arith.constant 0 : index
    %c0_35 = arith.constant 0 : index
    %48 = vector.load %arg14[%c0_34, %c0_35] : memref<128x128xf32, #tpu.memory_space<vmem>>, vector<128x128xf32>
    tpu.vector_store %arg14[%c0_34, %c0_35], %15 {strides = array<i32>} : memref<128x128xf32, #tpu.memory_space<vmem>>, vector<128x128xf32>,
    %c0_36 = arith.constant 0 : index
    %c0_37 = arith.constant 0 : index
    %49 = vector.load %arg15[%c0_36, %c0_37] : memref<128x128xf32, #tpu.memory_space<vmem>>, vector<128x128xf32>
    tpu.vector_store %arg15[%c0_36, %c0_37], %20 {strides = array<i32>} : memref<128x128xf32, #tpu.memory_space<vmem>>, vector<128x128xf32>,
    return
  }
  func.func @transform_0(%arg0: i32) -> (i32, i32) {
    %c0_i32 = arith.constant 0 : i32
    %c0_i32_0 = arith.constant 0 : i32
    return %arg0, %c0_i32 : i32, i32
  }
  func.func @transform_1(%arg0: i32) -> (i32, i32) {
    %c0_i32 = arith.constant 0 : i32
    %c0_i32_0 = arith.constant 0 : i32
    return %arg0, %c0_i32 : i32, i32
  }
  func.func @transform_2(%arg0: i32) -> (i32, i32) {
    %c0_i32 = arith.constant 0 : i32
    %c0_i32_0 = arith.constant 0 : i32
    %c0_i32_1 = arith.constant 0 : i32
    return %c0_i32, %c0_i32_0 : i32, i32
  }
  func.func @transform_3(%arg0: i32) -> (i32, i32) {
    %c0_i32 = arith.constant 0 : i32
    %c0_i32_0 = arith.constant 0 : i32
    %c0_i32_1 = arith.constant 0 : i32
    return %c0_i32, %c0_i32_0 : i32, i32
  }
  func.func @transform_4(%arg0: i32) -> (i32, i32) {
    %c0_i32 = arith.constant 0 : i32
    %c0_i32_0 = arith.constant 0 : i32
    %c0_i32_1 = arith.constant 0 : i32
    return %c0_i32, %c0_i32_0 : i32, i32
  }
  func.func @transform_5(%arg0: i32) -> (i32, i32) {
    %c0_i32 = arith.constant 0 : i32
    %c0_i32_0 = arith.constant 0 : i32
    %c0_i32_1 = arith.constant 0 : i32
    return %c0_i32, %c0_i32_0 : i32, i32
  }
  func.func @transform_6(%arg0: i32) -> (i32, i32) {
    %c0_i32 = arith.constant 0 : i32
    %c0_i32_0 = arith.constant 0 : i32
    %c0_i32_1 = arith.constant 0 : i32
    return %c0_i32, %c0_i32_0 : i32, i32
  }
  func.func @transform_7(%arg0: i32) -> (i32, i32) {
    %c0_i32 = arith.constant 0 : i32
    %c0_i32_0 = arith.constant 0 : i32
    %c0_i32_1 = arith.constant 0 : i32
    return %c0_i32, %c0_i32_0 : i32, i32
  }
  func.func @transform_8(%arg0: i32) -> (i32, i32) {
    %c0_i32 = arith.constant 0 : i32
    %c0_i32_0 = arith.constant 0 : i32
    %c0_i32_1 = arith.constant 0 : i32
    return %c0_i32, %c0_i32_0 : i32, i32
  }
  func.func @transform_9(%arg0: i32) -> (i32, i32) {
    %c0_i32 = arith.constant 0 : i32
    %c0_i32_0 = arith.constant 0 : i32
    %c0_i32_1 = arith.constant 0 : i32
    return %c0_i32, %c0_i32_0 : i32, i32
  }
  func.func @transform_10(%arg0: i32) -> (i32, i32) {
    %c0_i32 = arith.constant 0 : i32
    %c0_i32_0 = arith.constant 0 : i32
    %c0_i32_1 = arith.constant 0 : i32
    return %c0_i32, %c0_i32_0 : i32, i32
  }
  func.func @transform_11(%arg0: i32) -> (i32, i32) {
    %c0_i32 = arith.constant 0 : i32
    %c0_i32_0 = arith.constant 0 : i32
    %c0_i32_1 = arith.constant 0 : i32
    return %c0_i32, %c0_i32_0 : i32, i32
  }
  func.func @transform_12(%arg0: i32) -> (i32, i32) {
    %c0_i32 = arith.constant 0 : i32
    %c0_i32_0 = arith.constant 0 : i32
    return %arg0, %c0_i32 : i32, i32
  }
  func.func @transform_13(%arg0: i32) -> (i32, i32) {
    %c0_i32 = arith.constant 0 : i32
    %c0_i32_0 = arith.constant 0 : i32
    return %arg0, %c0_i32 : i32, i32
  }
  func.func @transform_14(%arg0: i32) -> (i32, i32) {
    %c0_i32 = arith.constant 0 : i32
    %c0_i32_0 = arith.constant 0 : i32
    return %arg0, %c0_i32 : i32, i32
  }
}

</mosaic_0001>

<bundles_post_ra>
// kernel: vae_forward.1
= control target key start
LH: loop header
LB: loop body
LE: loop exit
PB: predicated region body
PF: predicated region fallthrough
CT: control target
= control target key end

     0   :  { %s2362_s29 = smov 0   ;;  %s2792_s0 = inlined_call_operand.vmem [shape: f32[512,128], index: 0, kind: input, shape index: {}]   ;;  %s2793_s1 = inlined_call_operand.vmem [shape: f32[512,128], index: 1, kind: input, shape index: {}]   ;;  %s2794_s2 = inlined_call_operand.vmem [shape: bf16[128,128], index: 2, kind: input, shape index: {}]   ;;  %s2795_s3 = inlined_call_operand.vmem [shape: f32[1,128], index: 3, kind: input, shape index: {}]   ;;  %s2796_s4 = inlined_call_operand.vmem [shape: bf16[128,128], index: 4, kind: input, shape index: {}]   ;;  %s2797_s5 = inlined_call_operand.vmem [shape: f32[1,128], index: 5, kind: input, shape index: {}]   ;;  %s2798_s6 = inlined_call_operand.vmem [shape: bf16[128,128], index: 6, kind: input, shape index: {}]   ;;  %s2799_s7 = inlined_call_operand.vmem [shape: f32[1,128], index: 7, kind: input, shape index: {}]   ;;  %s2800_s8 = inlined_call_operand.vmem [shape: bf16[128,128], index: 8, kind: input, shape index: {}]   ;;  %s2801_s9 = inlined_call_operand.vmem [shape: f32[1,128], index: 9, kind: input, shape index: {}]   ;;  %s2802_s10 = inlined_call_operand.vmem [shape: bf16[128,128], index: 10, kind: input, shape index: {}]   ;;  %s2803_s11 = inlined_call_operand.vmem [shape: f32[1,128], index: 11, kind: input, shape index: {}]   ;;  %s2804_s12 = inlined_call_operand.vmem [shape: f32[512,128], index: 12, kind: output, shape index: {0}]   ;;  %s2805_s13 = inlined_call_operand.vmem [shape: f32[512,128], index: 13, kind: output, shape index: {1}]   ;;  %s2806_s14 = inlined_call_operand.vmem [shape: f32[512,128], index: 14, kind: output, shape index: {2}]  }
   0x1 LB: > { %s1817_s30 = sadd.s32 4294967295, %s2285_s29   ;;  %p1821_p0 = scmp.ge.s32.totalorder %s2285_s29, 1  ;;  %s2285_s29 = sphi %s2362_s29, %s25_s29  }
   0x2   : > { %p429_p1 = scmp.lt.s32.totalorder %s2285_s29, 5 }
   0x4   : > { %p430_p2 = pnand %p1821_p0, %p429_p1 }
   0x5   : > { %v2143_v0 = vld [vmem:[%s2794_s2] sm:$0xff] (!%p430_p2)   ;;  %s1822_s17 = sshll.u32 (!%p430_p2), %s1817_s30, 4  ;;  %v2144_v1 = vld [vmem:[%s2794_s2 + $0x8] sm:$0xff] (!%p430_p2)   ;;  %v2145_v2 = vld [vmem:[%s2794_s2 + $0x10] sm:$0xff] (!%p430_p2)  }
   0x6   : > { %433 = sbr.rel (%p430_p2) target bundleno = 995 (0x3e3), region = 68  ;;  %p491_p3 = scmp.lt.s32.totalorder (!%p430_p2), %s1822_s17, 63  ;;  %1959 = vmatprep.subr.bf16.mxu0 (!%p430_p2), %v2143_v0  ;;  %v2146_v3 = vld [vmem:[%s2794_s2 + $0x18] sm:$0xff] (!%p430_p2)   ;;  %v2147_v7 = vld [vmem:[%s2794_s2 + $0x20] sm:$0xff] (!%p430_p2)   ;;  %v2148_v9 = vld [vmem:[%s2794_s2 + $0x28] sm:$0xff] (!%p430_p2)  }
   0x7   : > { %1960 = vmatpush3.bf16.msra.mxu0 (!%p430_p2), %v2143_v0  ;;  %v2152_v8 = vld [vmem:[%s2796_s4] sm:$0xff] (!%p430_p2)   ;;  %v2154_v10 = vld [vmem:[%s2796_s4 + $0x8] sm:$0xff] (!%p430_p2)   ;;  %v2156_v11 = vld [vmem:[%s2796_s4 + $0x10] sm:$0xff] (!%p430_p2)  }
   0x8   : > { %1961 = vmatprep.subr.bf16.mxu0 (!%p430_p2), %v2144_v1  ;;  %1991 = vmatprep.subr.bf16.mxu1 (!%p430_p2), %v2152_v8  ;;  %v2149_v12 = vld [vmem:[%s2794_s2 + $0x30] sm:$0xff] (!%p430_p2)   ;;  %v2150_v13 = vld [vmem:[%s2794_s2 + $0x38] sm:$0xff] (!%p430_p2)   ;;  %v2160_v17 = vld [vmem:[%s2796_s4 + $0x20] sm:$0xff] (!%p430_p2)  }
   0x9   : > { %1992 = vmatpush3.bf16.msra.mxu1 (!%p430_p2), %v2152_v8  ;;  %v2158_v14 = vld [vmem:[%s2796_s4 + $0x18] sm:$0xff] (!%p430_p2)   ;;  %v2151_v20 = vld [vmem:[%s2798_s6] sm:$0xff] (!%p430_p2)   ;;  %v2153_v22 = vld [vmem:[%s2798_s6 + $0x8] sm:$0xff] (!%p430_p2)  }
   0xa   : > { %1993 = vmatprep.subr.bf16.mxu1 (!%p430_p2), %v2154_v10  ;;  %v2155_v28 = vld [vmem:[%s2798_s6 + $0x10] sm:$0xff] (!%p430_p2)   ;;  %v2157_v31 = vld [vmem:[%s2798_s6 + $0x18] sm:$0xff] (!%p430_p2)   ;;  %v2159_v36 = vld [vmem:[%s2798_s6 + $0x20] sm:$0xff] (!%p430_p2)  }
   0xb   : > { %1962 = vmatpush3.bf16.msra.mxu0 (!%p430_p2), %v2144_v1  ;;  %v2161_v42 = vld [vmem:[%s2798_s6 + $0x28] sm:$0xff] (!%p430_p2)   ;;  %v2163_v44 = vld [vmem:[%s2798_s6 + $0x30] sm:$0xff] (!%p430_p2)   ;;  %v2165_v46 = vld [vmem:[%s2798_s6 + $0x38] sm:$0xff] (!%p430_p2)  }
   0xc   : > { %1963 = vmatprep.subr.bf16.mxu0 (!%p430_p2), %v2145_v2  ;;  %v2162_v43 = vld [vmem:[%s2796_s4 + $0x28] sm:$0xff] (!%p430_p2)   ;;  %v2164_v45 = vld [vmem:[%s2796_s4 + $0x30] sm:$0xff] (!%p430_p2)   ;;  %v2166_v47 = vld [vmem:[%s2796_s4 + $0x38] sm:$0xff] (!%p430_p2)  }
   0xd   : > { %s2808_s17 = smov (!%p491_p3, %s1822_s17), 63  ;;  %1994 = vmatpush3.bf16.msra.mxu1 %v2154_v10  ;;  %v2167_v48 = vld [vmem:[%s2800_s8] sm:$0xff]  }
   0xe   : > { %s2379_s22 = sshll.u32 %s2808_s17, 3  ;;  %1995 = vmatprep.subr.bf16.mxu1 %v2156_v11  ;;  %v2472_v49 = vld [vmem:[%s2795_s3] ss:$0 sm:$0xff] }
   0xf   : > { %s2385_s25 = scalar_lea.vmem %s2792_s0, %s2379_s22  ;;  %1964 = vmatpush3.bf16.msra.mxu0 %v2145_v2  ;;  %s2574_s24 = scalar_lea.vmem %s2806_s14, %s2379_s22 }
  0x10   : > { %v521_v4 = vld [vmem:[%s2385_s25] sm:$0xff]  ;;  %v522_v5 = vld [vmem:[%s2385_s25 + $0x8] sm:$0xff]  ;;  %1965 = vmatprep.subr.bf16.mxu0 %v2146_v3  ;;  %v523_v15 = vld [vmem:[%s2385_s25 + $0x10] sm:$0xff]  ;;  %s2623_s28 = scalar_lea.vmem %s2793_s1, %s2379_s22 }
  0x11   : > { %v537_v6 = vpack.c.bf16 %v522_v5, %v521_v4  ;;  %v524_v16 = vld [vmem:[%s2385_s25 + $0x18] sm:$0xff]  ;;  %v525_v18 = vld [vmem:[%s2385_s25 + $0x20] sm:$0xff]  ;;  %v526_v19 = vld [vmem:[%s2385_s25 + $0x28] sm:$0xff]  ;;  %1996 = vmatpush3.bf16.msra.mxu1 %v2156_v11 }
  0x12   : > { %1997 = vmatprep.subr.bf16.mxu1 %v2158_v14  ;;  %v538_v21 = vpack.c.bf16 %v524_v16, %v523_v15  ;;  %v539_v23 = vpack.c.bf16 %v526_v19, %v525_v18  ;;  %v527_v24 = vld [vmem:[%s2385_s25 + $0x30] sm:$0xff]  ;;  %v528_v25 = vld [vmem:[%s2385_s25 + $0x38] sm:$0xff]  ;;  %v529_v26 = vld [vmem:[%s2385_s25 + $0x40] sm:$0xff] }
  0x13   : > { %1975 = vmatprep.mubr.bf16.mxu0 %v537_v6  ;;  %1966 = vmatpush3.bf16.msra.mxu0 %v2146_v3  ;;  %v530_v27 = vld [vmem:[%s2385_s25 + $0x48] sm:$0xff]  ;;  %v540_v29 = vpack.c.bf16 %v528_v25, %v527_v24  ;;  %v531_v32 = vld [vmem:[%s2385_s25 + $0x50] sm:$0xff]  ;;  %v532_v33 = vld [vmem:[%s2385_s25 + $0x58] sm:$0xff] }
  0x14   : > { %1967 = vmatprep.subr.bf16.mxu0 %v2147_v7  ;;  %v541_v30 = vpack.c.bf16 %v530_v27, %v529_v26  ;;  %v533_v34 = vld [vmem:[%s2385_s25 + $0x60] sm:$0xff]  ;;  %v534_v35 = vld [vmem:[%s2385_s25 + $0x68] sm:$0xff]  ;;  %v542_v37 = vpack.c.bf16 %v532_v33, %v531_v32  ;;  %v535_v39 = vld [vmem:[%s2385_s25 + $0x70] sm:$0xff] }
  0x15   : > { %1998 = vmatpush3.bf16.msra.mxu1 %v2158_v14  ;;  %v543_v38 = vpack.c.bf16 %v534_v35, %v533_v34  ;;  %v536_v40 = vld [vmem:[%s2385_s25 + $0x78] sm:$0xff]  ;;  %s2568_s25 = scalar_lea.vmem %s2805_s13, %s2379_s22 }
  0x16   : > { %1999 = vmatprep.subr.bf16.mxu1 %v2160_v17  ;;  %v544_v41 = vpack.c.bf16 %v536_v40, %v535_v39 }
  0x17   : > { %1968 = vmatpush3.bf16.msra.mxu0 %v2147_v7 }
  0x18   : > { %1969 = vmatprep.subr.bf16.mxu0 %v2148_v9 }
  0x19   : > { %2000 = vmatpush3.bf16.msra.mxu1 %v2160_v17 }
  0x1a   : > { %2001 = vmatprep.subr.bf16.mxu1 %v2162_v43 }
  0x1b   : > { %1970 = vmatpush3.bf16.msra.mxu0 %v2148_v9 }
  0x1c   : > { %1971 = vmatprep.subr.bf16.mxu0 %v2149_v12 }
  0x1d   : > { %2002 = vmatpush3.bf16.msra.mxu1 %v2162_v43 }
  0x1e   : > { %2003 = vmatprep.subr.bf16.mxu1 %v2164_v45 }
  0x1f   : > { %1972 = vmatpush3.bf16.msra.mxu0 %v2149_v12  ;;  %v2168_v12 = vld [vmem:[%s2800_s8 + $0x8] sm:$0xff]  }
  0x20   : > { %1973 = vmatprep.subr.bf16.mxu0 %v2150_v13 }
  0x21   : > { %2004 = vmatpush3.bf16.msra.mxu1 %v2164_v45 }
  0x22   : > { %2005 = vmatprep.subr.bf16.mxu1 %v2166_v47 }
  0x23   : > { %1974 = vmatpush3.bf16.msra.mxu0 %v2150_v13 }
  0x24   : > { %2023 = vmatprep.subr.bf16.mxu0 %v2151_v20 }
  0x25   : > { %2006 = vmatpush3.bf16.msra.mxu1 %v2166_v47 }
  0x26   : > { %1976 = vmatmul.mubr.bf16.vlgmr.msra.gmra.mrb[0].mxu0 %v538_v21  ;;  %2055 = vmatprep.subr.bf16.mxu1 %v2167_v48 }
  0x27   : > { %1979 = vmatprep.mubr.bf16.mxu0 %v539_v23  ;;  %2024 = vmatpush3.bf16.msra.mxu0 %v2151_v20 }
  0x28   : > { %2025 = vmatprep.subr.bf16.mxu0 %v2153_v22 }
  0x2b   : > { %2026 = vmatpush3.bf16.msra.mxu0 %v2153_v22 }
  0x2c   : > { %2027 = vmatprep.subr.bf16.mxu0 %v2155_v28 }
  0x2e   : > { %1980 = vmatmul.mubr.bf16.gmra.mrb[4].mxu0 %v540_v29 }
  0x2f   : > { %1983 = vmatprep.mubr.bf16.mxu0 %v541_v30  ;;  %2028 = vmatpush3.bf16.msra.mxu0 %v2155_v28 }
  0x30   : > { %2029 = vmatprep.subr.bf16.mxu0 %v2157_v31 }
  0x33   : > { %2030 = vmatpush3.bf16.msra.mxu0 %v2157_v31 }
  0x34   : > { %2031 = vmatprep.subr.bf16.mxu0 %v2159_v36 }
  0x36   : > { %1984 = vmatmul.mubr.bf16.gmra.mrb[8].mxu0 %v542_v37 }
  0x37   : > { %1987 = vmatprep.mubr.bf16.mxu0 %v543_v38  ;;  %2032 = vmatpush3.bf16.msra.mxu0 %v2159_v36 }
  0x38   : > { %2033 = vmatprep.subr.bf16.mxu0 %v2161_v42 }
  0x3b   : > { %2034 = vmatpush3.bf16.msra.mxu0 %v2161_v42 }
  0x3c   : > { %2035 = vmatprep.subr.bf16.mxu0 %v2163_v44 }
  0x3e   : > { %1988 = vmatmul.mubr.bf16.gmra.mrb[12].mxu0 %v544_v41 }
  0x3f   : > { %2036 = vmatpush3.bf16.msra.mxu0 %v2163_v44 }
  0x40   : > { %2037 = vmatprep.subr.bf16.mxu0 %v2165_v46 }
  0x43   : > { %2038 = vmatpush3.bf16.msra.mxu0 %v2165_v46 }
  0xf9   : > { %v1977_v50 = vpop.f32.mrb[0].mxu0 }
  0xfa   : > { %v659_v51 = vadd.f32 %v1977_v50, %v2472_v49  ;;  %v650_v52 = vpop.f32.mrb[1].mxu0 }
  0xfb   : > { %v651_v53 = vadd.f32 %v2472_v49, %v650_v52  ;;  %v1978_v54 = vpop.f32.mrb[2].mxu0 }
  0xfc   : > { %v715_v55 = vmul.f32 0.2, %v659_v51  ;;  %v662_v56 = vadd.f32 %v1978_v54, %v2472_v49  ;;  %v653_v57 = vpop.f32.mrb[3].mxu0 }
  0xfd   : > { %v713_v58 = vmul.f32 0.2, %v651_v53  ;;  %v654_v59 = vadd.f32 %v2472_v49, %v653_v57 }
  0xfe   : > { %v716_v60 = vmul.f32 0.2, %v662_v56  ;;  %v731_v62 = vmax.f32 %v659_v51, %v715_v55 }
  0xff   : > { %v714_v61 = vmul.f32 0.2, %v654_v59  ;;  %v729_v0 = vmax.f32 %v651_v53, %v713_v58 }
 0x100   : > { %v732_v63 = vmax.f32 %v662_v56, %v716_v60  ;;  %v2170_v60 = vld [vmem:[%s2800_s8 + $0x18] sm:$0xff]  }
 0x101   : > { %v730_v1 = vmax.f32 %v654_v59, %v714_v61  ;;  %v1981_v2 = vpop.f32.mrb[4].mxu0  ;;  %v2171_v61 = vld [vmem:[%s2800_s8 + $0x20] sm:$0xff]  }
 0x102   : > { %v675_v3 = vadd.f32 %v1981_v2, %v2472_v49  ;;  %v666_v4 = vpop.f32.mrb[5].mxu0  ;;  %v746_v5 = vpack.c.bf16 %v732_v63, %v731_v62  ;;  %v2172_v62 = vld [vmem:[%s2800_s8 + $0x28] sm:$0xff]   ;;  %v2173_v63 = vld [vmem:[%s2800_s8 + $0x30] sm:$0xff]  }
 0x103   : > { %v667_v6 = vadd.f32 %v2472_v49, %v666_v4  ;;  %v1982_v7 = vpop.f32.mrb[6].mxu0  ;;  %v745_v8 = vpack.c.bf16 %v730_v1, %v729_v0  ;;  %v2174_v0 = vld [vmem:[%s2800_s8 + $0x38] sm:$0xff]   ;;  %v2514_v1 = vld [vmem:[%s2802_s10] sm:$0xff]   ;;  %v2519_v2 = vld [vmem:[%s2802_s10 + $0x8] sm:$0xff]  }
 0x104   : > { %v719_v9 = vmul.f32 0.2, %v675_v3  ;;  %v678_v10 = vadd.f32 %v1982_v7, %v2472_v49  ;;  %v669_v11 = vpop.f32.mrb[7].mxu0  ;;  %2087 = vmatprep.subr.bf16.mxu0 %v2514_v1  ;;  %v2535_v4 = vld [vmem:[%s2802_s10 + $0x18] sm:$0xff]   ;;  %v2557_v7 = vld [vmem:[%s2797_s5] ss:$0 sm:$0xff] }
 0x105   : > { %v717_v13 = vmul.f32 0.2, %v667_v6  ;;  %v670_v14 = vadd.f32 %v2472_v49, %v669_v11  ;;  %2007 = vmatprep.mubr.bf16.mxu1 %v745_v8  ;;  %2039 = vmatprep.mubr.bf16.mxu0 %v745_v8  ;;  %v2562_v8 = vld [vmem:[%s2799_s7] ss:$0 sm:$0xff] }
 0x106   : > { %v720_v15 = vmul.f32 0.2, %v678_v10  ;;  %2008 = vmatmul.mubr.bf16.vlgmr.msra.gmra.mrb[0].mxu1 %v746_v5  ;;  %2040 = vmatmul.mubr.bf16.vlgmr.msra.gmra.mrb[16].mxu0 %v746_v5  ;;  %v735_v17 = vmax.f32 %v675_v3, %v719_v9  ;;  %v2528_v3 = vld [vmem:[%s2802_s10 + $0x10] sm:$0xff]   ;;  %v2542_v5 = vld [vmem:[%s2802_s10 + $0x20] sm:$0xff]  }
 0x107   : > { %v718_v16 = vmul.f32 0.2, %v670_v14  ;;  %2056 = vmatpush3.bf16.msra.mxu1 %v2167_v48  ;;  %v733_v19 = vmax.f32 %v667_v6, %v717_v13  ;;  %2088 = vmatpush3.bf16.msra.mxu0 %v2514_v1  ;;  %v2549_v6 = vld [vmem:[%s2802_s10 + $0x28] sm:$0xff]  }
 0x108   : > { %v736_v18 = vmax.f32 %v678_v10, %v720_v15  ;;  %2057 = vmatprep.subr.bf16.mxu1 %v2168_v12  ;;  %2089 = vmatprep.subr.bf16.mxu0 %v2519_v2 }
 0x109   : > { %v734_v20 = vmax.f32 %v670_v14, %v718_v16  ;;  %v1985_v21 = vpop.f32.mrb[8].mxu0 }
 0x10a   : > { %v691_v22 = vadd.f32 %v1985_v21, %v2472_v49  ;;  %v682_v23 = vpop.f32.mrb[9].mxu0  ;;  %v748_v24 = vpack.c.bf16 %v736_v18, %v735_v17 }
 0x10b   : > { %v683_v25 = vadd.f32 %v2472_v49, %v682_v23  ;;  %v1986_v26 = vpop.f32.mrb[10].mxu0  ;;  %v747_v27 = vpack.c.bf16 %v734_v20, %v733_v19  ;;  %2058 = vmatpush3.bf16.msra.mxu1 %v2168_v12  ;;  %2090 = vmatpush3.bf16.msra.mxu0 %v2519_v2 }
 0x10c   : > { %v723_v28 = vmul.f32 0.2, %v691_v22  ;;  %v694_v29 = vadd.f32 %v1986_v26, %v2472_v49  ;;  %v685_v30 = vpop.f32.mrb[11].mxu0  ;;  %2091 = vmatprep.subr.bf16.mxu0 %v2528_v3 }
 0x10d   : > { %v721_v31 = vmul.f32 0.2, %v683_v25  ;;  %v686_v32 = vadd.f32 %v2472_v49, %v685_v30  ;;  %2011 = vmatprep.mubr.bf16.mxu1 %v747_v27  ;;  %2043 = vmatprep.mubr.bf16.mxu0 %v747_v27 }
 0x10e   : > { %v724_v33 = vmul.f32 0.2, %v694_v29  ;;  %2012 = vmatmul.mubr.bf16.gmra.mrb[4].mxu1 %v748_v24  ;;  %2044 = vmatmul.mubr.bf16.gmra.mrb[20].mxu0 %v748_v24  ;;  %v739_v35 = vmax.f32 %v691_v22, %v723_v28 }
 0x10f   : > { %v722_v34 = vmul.f32 0.2, %v686_v32  ;;  %v737_v37 = vmax.f32 %v683_v25, %v721_v31  ;;  %2092 = vmatpush3.bf16.msra.mxu0 %v2528_v3 }
 0x110   : > { %v740_v36 = vmax.f32 %v694_v29, %v724_v33  ;;  %2093 = vmatprep.subr.bf16.mxu0 %v2535_v4 }
 0x111   : > { %v738_v38 = vmax.f32 %v686_v32, %v722_v34  ;;  %v1989_v39 = vpop.f32.mrb[12].mxu0 }
 0x112   : > { %v707_v40 = vadd.f32 %v1989_v39, %v2472_v49  ;;  %v698_v41 = vpop.f32.mrb[13].mxu0  ;;  %v750_v42 = vpack.c.bf16 %v740_v36, %v739_v35 }
 0x113   : > { %v699_v43 = vadd.f32 %v2472_v49, %v698_v41  ;;  %v1990_v44 = vpop.f32.mrb[14].mxu0  ;;  %v749_v45 = vpack.c.bf16 %v738_v38, %v737_v37  ;;  %2094 = vmatpush3.bf16.msra.mxu0 %v2535_v4 }
 0x114   : > { %v727_v46 = vmul.f32 0.2, %v707_v40  ;;  %v710_v47 = vadd.f32 %v1990_v44, %v2472_v49  ;;  %v701_v48 = vpop.f32.mrb[15].mxu0  ;;  %2095 = vmatprep.subr.bf16.mxu0 %v2542_v5 }
 0x115   : > { %v725_v50 = vmul.f32 0.2, %v699_v43  ;;  %v702_v51 = vadd.f32 %v2472_v49, %v701_v48  ;;  %2015 = vmatprep.mubr.bf16.mxu1 %v749_v45  ;;  %2047 = vmatprep.mubr.bf16.mxu0 %v749_v45  ;;  %v2169_v49 = vld [vmem:[%s2800_s8 + $0x10] sm:$0xff]  }
 0x116   : > { %v728_v52 = vmul.f32 0.2, %v710_v47  ;;  %2016 = vmatmul.mubr.bf16.gmra.mrb[8].mxu1 %v750_v42  ;;  %2048 = vmatmul.mubr.bf16.gmra.mrb[24].mxu0 %v750_v42  ;;  %v743_v54 = vmax.f32 %v707_v40, %v727_v46 }
 0x117   : > { %v726_v53 = vmul.f32 0.2, %v702_v51  ;;  %v741_v56 = vmax.f32 %v699_v43, %v725_v50  ;;  %2059 = vmatprep.subr.bf16.mxu1 %v2169_v49  ;;  %2096 = vmatpush3.bf16.msra.mxu0 %v2542_v5 }
 0x118   : > { %v744_v55 = vmax.f32 %v710_v47, %v728_v52  ;;  %2060 = vmatpush3.bf16.msra.mxu1 %v2169_v49  ;;  %2097 = vmatprep.subr.bf16.mxu0 %v2549_v6 }
 0x119   : > { %v742_v57 = vmax.f32 %v702_v51, %v726_v53  ;;  %2061 = vmatprep.subr.bf16.mxu1 %v2170_v60 }
 0x11a   : > { %v752_v58 = vpack.c.bf16 %v744_v55, %v743_v54 }
 0x11b   : > { %v751_v59 = vpack.c.bf16 %v742_v57, %v741_v56  ;;  %2098 = vmatpush3.bf16.msra.mxu0 %v2549_v6  ;;  %v1139_v56 = vld [vmem:[%s2623_s28 + $0x10] sm:$0xff] }
 0x11c   : > { %2062 = vmatpush3.bf16.msra.mxu1 %v2170_v60  ;;  %v1137_v60 = vld [vmem:[%s2623_s28] sm:$0xff] }
 0x11d   : > { %2019 = vmatprep.mubr.bf16.mxu1 %v751_v59  ;;  %2051 = vmatprep.mubr.bf16.mxu0 %v751_v59 }
 0x11e   : > { %2020 = vmatmul.mubr.bf16.gmra.mrb[12].mxu1 %v752_v58  ;;  %2052 = vmatmul.mubr.bf16.gmra.mrb[28].mxu0 %v752_v58 }
 0x11f   : > { %2063 = vmatprep.subr.bf16.mxu1 %v2171_v61 }
 0x120   : > { %2064 = vmatpush3.bf16.msra.mxu1 %v2171_v61 }
 0x121   : > { %2065 = vmatprep.subr.bf16.mxu1 %v2172_v62 }
 0x124   : > { %2066 = vmatpush3.bf16.msra.mxu1 %v2172_v62  ;;  %v1140_v62 = vld [vmem:[%s2623_s28 + $0x18] sm:$0xff] }
 0x125   : > { %2067 = vmatprep.subr.bf16.mxu1 %v2173_v63 }
 0x128   : > { %2068 = vmatpush3.bf16.msra.mxu1 %v2173_v63 }
 0x129   : > { %2069 = vmatprep.subr.bf16.mxu1 %v2174_v0 }
 0x12c   : > { %2070 = vmatpush3.bf16.msra.mxu1 %v2174_v0 }
 0x12d   : > { %2119 = vmatprep.subr.bf16.mxu1 %v2514_v1 }
 0x1d9   : > { %v2009_v9 = vpop.f32.mrb[0].mxu1  ;;  %v2041_v10 = vpop.f32.mrb[16].mxu0 }
 0x1da   : > { %v2577_v11 = vadd.f32 %v2009_v9, %v2557_v7  ;;  %v1035_v12 = vadd.f32 %v2041_v10, %v2562_v8  ;;  %v858_v13 = vpop.f32.mrb[1].mxu1  ;;  %v1026_v14 = vpop.f32.mrb[17].mxu0 }
 0x1db   : > { %v2581_v15 = vadd.f32 %v2557_v7, %v858_v13  ;;  %v1027_v16 = vadd.f32 %v2562_v8, %v1026_v14  ;;  %v2010_v17 = vpop.f32.mrb[2].mxu1  ;;  %v2042_v18 = vpop.f32.mrb[18].mxu0 }
 0x1dc   : > { %1651 = vst [vmem:[%s2568_s25 + $0x10] sm:$0xff] %v2577_v11  ;;  %v1091_v19 = vmul.f32 0.5, %v1035_v12  ;;  %1667 = vst [vmem:[%s2574_s24 + $0x10] sm:$0xff] %v1035_v12  ;;  %v2588_v20 = vadd.f32 %v2010_v17, %v2557_v7  ;;  %v1038_v21 = vadd.f32 %v2042_v18, %v2562_v8  ;;  %v861_v22 = vpop.f32.mrb[3].mxu1  ;;  %v1029_v23 = vpop.f32.mrb[19].mxu0 }
 0x1dd   : > { %1649 = vst [vmem:[%s2568_s25] sm:$0xff] %v2581_v15  ;;  %v1089_v24 = vmul.f32 0.5, %v1027_v16  ;;  %1665 = vst [vmem:[%s2574_s24] sm:$0xff] %v1027_v16  ;;  %v2595_v25 = vadd.f32 %v2557_v7, %v861_v22  ;;  %v1030_v26 = vadd.f32 %v2562_v8, %v1029_v23 }
 0x1de   : > { %v1109_v27 = vmul.f32 1.442695, %v1091_v19  ;;  %1652 = vst [vmem:[%s2568_s25 + $0x18] sm:$0xff] %v2588_v20  ;;  %v1092_v28 = vmul.f32 0.5, %v1038_v21  ;;  %1668 = vst [vmem:[%s2574_s24 + $0x18] sm:$0xff] %v1038_v21  ;;  %v1138_v19 = vld [vmem:[%s2623_s28 + $0x8] sm:$0xff] }
 0x1df   : > { %v1105_v29 = vmul.f32 1.442695, %v1089_v24  ;;  %1650 = vst [vmem:[%s2568_s25 + $0x8] sm:$0xff] %v2595_v25  ;;  %v1090_v30 = vmul.f32 0.5, %v1030_v26  ;;  %1666 = vst [vmem:[%s2574_s24 + $0x8] sm:$0xff] %v1030_v26 }
 0x1e0   : > { %2183 = vpow2.f32 %v1109_v27  ;;  %v1111_v31 = vmul.f32 1.442695, %v1092_v28 }
 0x1e1   : > { %2185 = vpow2.f32 %v1105_v29  ;;  %v1107_v32 = vmul.f32 1.442695, %v1090_v30  ;;  %v2013_v33 = vpop.f32.mrb[4].mxu1  ;;  %v2045_v34 = vpop.f32.mrb[20].mxu0 }
 0x1e2   : > { %2187 = vpow2.f32 %v1111_v31  ;;  %v2605_v35 = vadd.f32 %v2013_v33, %v2557_v7  ;;  %v1051_v36 = vadd.f32 %v2045_v34, %v2562_v8  ;;  %v874_v37 = vpop.f32.mrb[5].mxu1  ;;  %v1042_v38 = vpop.f32.mrb[21].mxu0 }
 0x1e3   : > { %2189 = vpow2.f32 %v1107_v32  ;;  %v2609_v39 = vadd.f32 %v2557_v7, %v874_v37  ;;  %v1043_v40 = vadd.f32 %v2562_v8, %v1042_v38  ;;  %v2014_v41 = vpop.f32.mrb[6].mxu1  ;;  %v2046_v42 = vpop.f32.mrb[22].mxu0 }
 0x1e4   : > { %1655 = vst [vmem:[%s2568_s25 + $0x30] sm:$0xff] %v2605_v35  ;;  %v1095_v43 = vmul.f32 0.5, %v1051_v36  ;;  %1671 = vst [vmem:[%s2574_s24 + $0x30] sm:$0xff] %v1051_v36  ;;  %v2616_v44 = vadd.f32 %v2014_v41, %v2557_v7  ;;  %v1054_v45 = vadd.f32 %v2046_v42, %v2562_v8  ;;  %v877_v46 = vpop.f32.mrb[7].mxu1  ;;  %v1045_v47 = vpop.f32.mrb[23].mxu0 }
 0x1e5   : > { %1653 = vst [vmem:[%s2568_s25 + $0x20] sm:$0xff] %v2609_v39  ;;  %v1093_v48 = vmul.f32 0.5, %v1043_v40  ;;  %1669 = vst [vmem:[%s2574_s24 + $0x20] sm:$0xff] %v1043_v40  ;;  %v2629_v50 = vadd.f32 %v2557_v7, %v877_v46  ;;  %v1046_v51 = vadd.f32 %v2562_v8, %v1045_v47  ;;  %v1143_v47 = vld [vmem:[%s2623_s28 + $0x30] sm:$0xff] }
 0x1e6   : > { %v1117_v52 = vmul.f32 1.442695, %v1095_v43  ;;  %1656 = vst [vmem:[%s2568_s25 + $0x38] sm:$0xff] %v2616_v44  ;;  %v1096_v53 = vmul.f32 0.5, %v1054_v45  ;;  %1672 = vst [vmem:[%s2574_s24 + $0x38] sm:$0xff] %v1054_v45 }
 0x1e7   : > { %v1113_v54 = vmul.f32 1.442695, %v1093_v48  ;;  %1654 = vst [vmem:[%s2568_s25 + $0x28] sm:$0xff] %v2629_v50  ;;  %v1094_v55 = vmul.f32 0.5, %v1046_v51  ;;  %1670 = vst [vmem:[%s2574_s24 + $0x28] sm:$0xff] %v1046_v51 }
 0x1e8   : > { %2191 = vpow2.f32 %v1117_v52  ;;  %v1119_v57 = vmul.f32 1.442695, %v1096_v53  ;;  %v1141_v53 = vld [vmem:[%s2623_s28 + $0x20] sm:$0xff] }
 0x1e9   : > { %2193 = vpow2.f32 %v1113_v54  ;;  %v1115_v58 = vmul.f32 1.442695, %v1094_v55  ;;  %v2017_v59 = vpop.f32.mrb[8].mxu1  ;;  %v2049_v49 = vpop.f32.mrb[24].mxu0 }
 0x1ea   : > { %v2184_v61 = vpop.eup %2183  ;;  %2195 = vpow2.f32 %v1119_v57  ;;  %v2642_v63 = vadd.f32 %v2017_v59, %v2557_v7  ;;  %v1067_v0 = vadd.f32 %v2049_v49, %v2562_v8  ;;  %v890_v9 = vpop.f32.mrb[9].mxu1  ;;  %v1144_v57 = vld [vmem:[%s2623_s28 + $0x38] sm:$0xff] }
 0x1eb   : > { %v1058_v10 = vpop.f32.mrb[25].mxu0  ;;  %v2186_v12 = vpop.eup %2185  ;;  %v1155_v13 = vmul.f32 %v2184_v61, %v1139_v56  ;;  %2197 = vpow2.f32 %v1115_v58  ;;  %v2646_v14 = vadd.f32 %v2557_v7, %v890_v9 }
 0x1ec   : > { %v1059_v16 = vadd.f32 %v2562_v8, %v1058_v10  ;;  %v2018_v17 = vpop.f32.mrb[10].mxu1  ;;  %v2050_v18 = vpop.f32.mrb[26].mxu0  ;;  %1659 = vst [vmem:[%s2568_s25 + $0x50] sm:$0xff] %v2642_v63  ;;  %v1099_v22 = vmul.f32 0.5, %v1067_v0  ;;  %1675 = vst [vmem:[%s2574_s24 + $0x50] sm:$0xff] %v1067_v0  ;;  %v1153_v28 = vmul.f32 %v2186_v12, %v1137_v60 }
 0x1ed   : > { %v2188_v21 = vpop.eup %2187  ;;  %v2654_v23 = vadd.f32 %v2018_v17, %v2557_v7  ;;  %v1070_v24 = vadd.f32 %v2050_v18, %v2562_v8  ;;  %v893_v26 = vpop.f32.mrb[11].mxu1  ;;  %1657 = vst [vmem:[%s2568_s25 + $0x40] sm:$0xff] %v2646_v14  ;;  %v1171_v42 = vadd.f32 %v1155_v13, %v2577_v11 }
 0x1ee   : > { %v1061_v27 = vpop.f32.mrb[27].mxu0  ;;  %v2190_v29 = vpop.eup %2189  ;;  %v1156_v30 = vmul.f32 %v2188_v21, %v1140_v62  ;;  %v1097_v31 = vmul.f32 0.5, %v1059_v16  ;;  %1673 = vst [vmem:[%s2574_s24 + $0x40] sm:$0xff] %v1059_v16  ;;  %v2661_v32 = vadd.f32 %v2557_v7, %v893_v26  ;;  %v1125_v34 = vmul.f32 1.442695, %v1099_v22  ;;  %v1142_v62 = vld [vmem:[%s2623_s28 + $0x28] sm:$0xff] }
 0x1ef   : > { %v1062_v33 = vadd.f32 %v2562_v8, %v1061_v27  ;;  %1660 = vst [vmem:[%s2568_s25 + $0x58] sm:$0xff] %v2654_v23  ;;  %v1100_v36 = vmul.f32 0.5, %v1070_v24  ;;  %1676 = vst [vmem:[%s2574_s24 + $0x58] sm:$0xff] %v1070_v24  ;;  %v1154_v37 = vmul.f32 %v2190_v29, %v1138_v19  ;;  %v1169_v38 = vadd.f32 %v1153_v28, %v2581_v15 }
 0x1f0   : > { %v1121_v40 = vmul.f32 1.442695, %v1097_v31  ;;  %1658 = vst [vmem:[%s2568_s25 + $0x48] sm:$0xff] %v2661_v32  ;;  %v1172_v43 = vadd.f32 %v1156_v30, %v2588_v20  ;;  %2199 = vpow2.f32 %v1125_v34 }
 0x1f1   : > { %v1098_v41 = vmul.f32 0.5, %v1062_v33  ;;  %1674 = vst [vmem:[%s2574_s24 + $0x48] sm:$0xff] %v1062_v33  ;;  %v1127_v45 = vmul.f32 1.442695, %v1100_v36  ;;  %v1170_v46 = vadd.f32 %v1154_v37, %v2595_v25  ;;  %v2021_v51 = vpop.f32.mrb[12].mxu1  ;;  %v2053_v15 = vpop.f32.mrb[28].mxu0 }
 0x1f2   : > { %2201 = vpow2.f32 %v1121_v40  ;;  %v1186_v52 = vpack.c.bf16 %v1172_v43, %v1171_v42  ;;  %v2192_v54 = vpop.eup %2191  ;;  %v2677_v11 = vadd.f32 %v2021_v51, %v2557_v7  ;;  %v1083_v20 = vadd.f32 %v2053_v15, %v2562_v8  ;;  %v906_v55 = vpop.f32.mrb[13].mxu1  ;;  %v1147_v36 = vld [vmem:[%s2623_s28 + $0x50] sm:$0xff]  ;;  %v1148_v42 = vld [vmem:[%s2623_s28 + $0x58] sm:$0xff] }
 0x1f3   : > { %v1123_v48 = vmul.f32 1.442695, %v1098_v41  ;;  %2203 = vpow2.f32 %v1127_v45  ;;  %v1074_v56 = vpop.f32.mrb[29].mxu0  ;;  %v1185_v25 = vpack.c.bf16 %v1170_v46, %v1169_v38  ;;  %v2194_v58 = vpop.eup %2193  ;;  %v2682_v59 = vadd.f32 %v2557_v7, %v906_v55  ;;  %v1145_v38 = vld [vmem:[%s2623_s28 + $0x40] sm:$0xff] }
 0x1f4   : > { %v1075_v49 = vadd.f32 %v2562_v8, %v1074_v56  ;;  %v2022_v60 = vpop.f32.mrb[14].mxu1  ;;  %v2054_v61 = vpop.f32.mrb[30].mxu0  ;;  %v1159_v0 = vmul.f32 %v2192_v54, %v1143_v47  ;;  %1663 = vst [vmem:[%s2568_s25 + $0x70] sm:$0xff] %v2677_v11  ;;  %v1103_v10 = vmul.f32 0.5, %v1083_v20  ;;  %1679 = vst [vmem:[%s2574_s24 + $0x70] sm:$0xff] %v1083_v20  ;;  %v1157_v18 = vmul.f32 %v2194_v58, %v1141_v53  ;;  %v1151_v53 = vld [vmem:[%s2623_s28 + $0x70] sm:$0xff] }
 0x1f5   : > { %2205 = vpow2.f32 %v1123_v48  ;;  %v2196_v9 = vpop.eup %2195  ;;  %v2690_v12 = vadd.f32 %v2022_v60, %v2557_v7  ;;  %v1086_v13 = vadd.f32 %v2054_v61, %v2562_v8  ;;  %v909_v16 = vpop.f32.mrb[15].mxu1  ;;  %2071 = vmatprep.mubr.bf16.mxu1 %v1185_v25  ;;  %1661 = vst [vmem:[%s2568_s25 + $0x60] sm:$0xff] %v2682_v59  ;;  %v1149_v20 = vld [vmem:[%s2623_s28 + $0x60] sm:$0xff]  ;;  %v1152_v25 = vld [vmem:[%s2623_s28 + $0x78] sm:$0xff] }
 0x1f6   : > { %v1077_v17 = vpop.f32.mrb[31].mxu0  ;;  %v2198_v19 = vpop.eup %2197  ;;  %v1101_v21 = vmul.f32 0.5, %v1075_v49  ;;  %1677 = vst [vmem:[%s2574_s24 + $0x60] sm:$0xff] %v1075_v49  ;;  %v2697_v22 = vadd.f32 %v2557_v7, %v909_v16  ;;  %2072 = vmatmul.mubr.bf16.vlgmr.msra.gmra.mrb[16].mxu1 %v1186_v52  ;;  %v1160_v26 = vmul.f32 %v2196_v9, %v1144_v57  ;;  %v1133_v27 = vmul.f32 1.442695, %v1103_v10  ;;  %v1150_v57 = vld [vmem:[%s2623_s28 + $0x68] sm:$0xff] }
 0x1f7   : > { %v1078_v24 = vadd.f32 %v2562_v8, %v1077_v17  ;;  %1664 = vst [vmem:[%s2568_s25 + $0x78] sm:$0xff] %v2690_v12  ;;  %v1104_v28 = vmul.f32 0.5, %v1086_v13  ;;  %1680 = vst [vmem:[%s2574_s24 + $0x78] sm:$0xff] %v1086_v13  ;;  %v1158_v29 = vmul.f32 %v2198_v19, %v1142_v62  ;;  %v1173_v30 = vadd.f32 %v1157_v18, %v2609_v39 }
 0x1f8   : > { %2127 = vmatpush3.bf16.msra.mxu1 %v2514_v1  ;;  %v1129_v31 = vmul.f32 1.442695, %v1101_v21  ;;  %1662 = vst [vmem:[%s2568_s25 + $0x68] sm:$0xff] %v2697_v22  ;;  %v1175_v8 = vadd.f32 %v1159_v0, %v2605_v35  ;;  %v1176_v33 = vadd.f32 %v1160_v26, %v2616_v44  ;;  %2207 = vpow2.f32 %v1133_v27  ;;  %v1146_v44 = vld [vmem:[%s2623_s28 + $0x48] sm:$0xff] }
 0x1f9   : > { %v1102_v7 = vmul.f32 0.5, %v1078_v24  ;;  %1678 = vst [vmem:[%s2574_s24 + $0x68] sm:$0xff] %v1078_v24  ;;  %2120 = vmatprep.subr.bf16.mxu1 %v2519_v2  ;;  %v1135_v34 = vmul.f32 1.442695, %v1104_v28  ;;  %v1174_v39 = vadd.f32 %v1158_v29, %v2629_v50  ;;  %s2770_s24 = scalar_lea.vmem %s2804_s12, %s2379_s22 }
 0x1fa   : > { %2209 = vpow2.f32 %v1129_v31  ;;  %v1188_v37 = vpack.c.bf16 %v1176_v33, %v1175_v8  ;;  %v2200_v40 = vpop.eup %2199 }
 0x1fb   : > { %v1131_v1 = vmul.f32 1.442695, %v1102_v7  ;;  %2211 = vpow2.f32 %v1135_v34  ;;  %v1187_v41 = vpack.c.bf16 %v1174_v39, %v1173_v30  ;;  %v1163_v43 = vmul.f32 %v2200_v40, %v1147_v36 }
 0x1fc   : > { %2128 = vmatpush3.bf16.msra.mxu1 %v2519_v2  ;;  %v2202_v35 = vpop.eup %2201 }
 0x1fd   : > { %2213 = vpow2.f32 %v1131_v1  ;;  %2121 = vmatprep.subr.bf16.mxu1 %v2528_v3  ;;  %v2204_v50 = vpop.eup %2203  ;;  %2075 = vmatprep.mubr.bf16.mxu1 %v1187_v41  ;;  %v1161_v45 = vmul.f32 %v2202_v35, %v1145_v38  ;;  %v1179_v48 = vadd.f32 %v1163_v43, %v2642_v63 }
 0x1fe   : > { %2076 = vmatmul.mubr.bf16.gmra.mrb[20].mxu1 %v1188_v37  ;;  %v1164_v47 = vmul.f32 %v2204_v50, %v1148_v42 }
 0x1ff   : > { %v2206_v46 = vpop.eup %2205  ;;  %v1177_v2 = vadd.f32 %v1161_v45, %v2646_v14 }
 0x200   : > { %v1162_v51 = vmul.f32 %v2206_v46, %v1146_v44  ;;  %2129 = vmatpush3.bf16.msra.mxu1 %v2528_v3  ;;  %v1180_v15 = vadd.f32 %v1164_v47, %v2654_v23 }
 0x201   : > { %2122 = vmatprep.subr.bf16.mxu1 %v2535_v4 }
 0x202   : > { %v1178_v52 = vadd.f32 %v1162_v51, %v2661_v32  ;;  %v1190_v54 = vpack.c.bf16 %v1180_v15, %v1179_v48  ;;  %v2208_v55 = vpop.eup %2207 }
 0x203   : > { %v1167_v58 = vmul.f32 %v2208_v55, %v1151_v53 }
 0x204   : > { %v1189_v56 = vpack.c.bf16 %v1178_v52, %v1177_v2  ;;  %2130 = vmatpush3.bf16.msra.mxu1 %v2535_v4  ;;  %v2210_v63 = vpop.eup %2209 }
 0x205   : > { %2123 = vmatprep.subr.bf16.mxu1 %v2542_v5  ;;  %v2212_v3 = vpop.eup %2211  ;;  %v1165_v14 = vmul.f32 %v2210_v63, %v1149_v20  ;;  %v1183_v32 = vadd.f32 %v1167_v58, %v2677_v11  ;;  %v2181_v11 = vld [vmem:[%s2802_s10 + $0x30] sm:$0xff]  }
 0x206   : > { %2079 = vmatprep.mubr.bf16.mxu1 %v1189_v56  ;;  %v1168_v49 = vmul.f32 %v2212_v3, %v1152_v25  ;;  %2099 = vmatprep.subr.bf16.mxu0 %v2181_v11 }
 0x207   : > { %v2214_v23 = vpop.eup %2213  ;;  %2080 = vmatmul.mubr.bf16.gmra.mrb[24].mxu1 %v1190_v54  ;;  %v1181_v61 = vadd.f32 %v1165_v14, %v2682_v59  ;;  %2100 = vmatpush3.bf16.msra.mxu0 %v2181_v11 }
 0x208   : > { %v1166_v60 = vmul.f32 %v2214_v23, %v1150_v57  ;;  %2131 = vmatpush3.bf16.msra.mxu1 %v2542_v5  ;;  %v1184_v4 = vadd.f32 %v1168_v49, %v2690_v12  ;;  %v2182_v5 = vld [vmem:[%s2802_s10 + $0x38] sm:$0xff]  }
 0x209   : > { %2124 = vmatprep.subr.bf16.mxu1 %v2549_v6  ;;  %2101 = vmatprep.subr.bf16.mxu0 %v2182_v5 }
 0x20a   : > { %v1182_v62 = vadd.f32 %v1166_v60, %v2697_v22  ;;  %v1192_v0 = vpack.c.bf16 %v1184_v4, %v1183_v32 }
 0x20b   : > { %2102 = vmatpush3.bf16.msra.mxu0 %v2182_v5 }
 0x20c   : > { %v1191_v9 = vpack.c.bf16 %v1182_v62, %v1181_v61  ;;  %2132 = vmatpush3.bf16.msra.mxu1 %v2549_v6  ;;  %v1859_v6 = vld [vmem:[%s2801_s9] ss:$0 sm:$0xff] }
 0x20d   : > { %2125 = vmatprep.subr.bf16.mxu1 %v2181_v11  ;;  %v2749_v61 = vld [vmem:[%s2803_s11] ss:$0 sm:$0xff] }
 0x20e   : > { %2083 = vmatprep.mubr.bf16.mxu1 %v1191_v9 }
 0x20f   : > { %2084 = vmatmul.mubr.bf16.gmra.mrb[28].mxu1 %v1192_v0 }
 0x210   : > { %2133 = vmatpush3.bf16.msra.mxu1 %v2181_v11 }
 0x211   : > { %2126 = vmatprep.subr.bf16.mxu1 %v2182_v5 }
 0x214   : > { %2134 = vmatpush3.bf16.msra.mxu1 %v2182_v5 }
 0x2c9   : > { %v2073_v59 = vpop.f32.mrb[16].mxu1 }
 0x2ca   : > { %v1307_v10 = vadd.f32 %v2073_v59, %v1859_v6  ;;  %v1298_v12 = vpop.f32.mrb[17].mxu1 }
 0x2cb   : > { %v1299_v13 = vadd.f32 %v1859_v6, %v1298_v12  ;;  %v2074_v16 = vpop.f32.mrb[18].mxu1 }
 0x2cc   : > { %v1310_v17 = vadd.f32 %v2074_v16, %v1859_v6  ;;  %v1301_v18 = vpop.f32.mrb[19].mxu1  ;;  %v1363_v21 = vmax.f32 %v1307_v10, 0.0 }
 0x2cd   : > { %v1302_v19 = vadd.f32 %v1859_v6, %v1301_v18  ;;  %v1361_v24 = vmax.f32 %v1299_v13, 0.0 }
 0x2ce   : > { %v1364_v22 = vmax.f32 %v1310_v17, 0.0 }
 0x2cf   : > { %v1362_v26 = vmax.f32 %v1302_v19, 0.0 }
 0x2d0   : > { %v1378_v27 = vpack.c.bf16 %v1364_v22, %v1363_v21 }
 0x2d1   : > { %v1377_v28 = vpack.c.bf16 %v1362_v26, %v1361_v24  ;;  %v2077_v29 = vpop.f32.mrb[20].mxu1 }
 0x2d2   : > { %v1323_v30 = vadd.f32 %v2077_v29, %v1859_v6  ;;  %v1314_v31 = vpop.f32.mrb[21].mxu1 }
 0x2d3   : > { %v1315_v7 = vadd.f32 %v1859_v6, %v1314_v31  ;;  %v2078_v8 = vpop.f32.mrb[22].mxu1  ;;  %2103 = vmatprep.mubr.bf16.mxu0 %v1377_v28 }
 0x2d4   : > { %v1326_v33 = vadd.f32 %v2078_v8, %v1859_v6  ;;  %v1317_v34 = vpop.f32.mrb[23].mxu1  ;;  %2104 = vmatmul.mubr.bf16.vlgmr.msra.gmra.mrb[32].mxu0 %v1378_v27  ;;  %v1367_v36 = vmax.f32 %v1323_v30, 0.0 }
 0x2d5   : > { %v1318_v39 = vadd.f32 %v1859_v6, %v1317_v34  ;;  %v1365_v37 = vmax.f32 %v1315_v7, 0.0 }
 0x2d6   : > { %v1368_v1 = vmax.f32 %v1326_v33, 0.0 }
 0x2d7   : > { %v1366_v38 = vmax.f32 %v1318_v39, 0.0 }
 0x2d8   : > { %v1380_v40 = vpack.c.bf16 %v1368_v1, %v1367_v36 }
 0x2d9   : > { %v1379_v41 = vpack.c.bf16 %v1366_v38, %v1365_v37 }
 0x2da   : > { %v2081_v42 = vpop.f32.mrb[24].mxu1 }
 0x2db   : > { %v1339_v35 = vadd.f32 %v2081_v42, %v1859_v6  ;;  %v1330_v44 = vpop.f32.mrb[25].mxu1  ;;  %2107 = vmatprep.mubr.bf16.mxu0 %v1379_v41 }
 0x2dc   : > { %v1331_v43 = vadd.f32 %v1859_v6, %v1330_v44  ;;  %v2082_v50 = vpop.f32.mrb[26].mxu1  ;;  %2108 = vmatmul.mubr.bf16.gmra.mrb[36].mxu0 %v1380_v40 }
 0x2dd   : > { %v1342_v45 = vadd.f32 %v2082_v50, %v1859_v6  ;;  %v1333_v46 = vpop.f32.mrb[27].mxu1  ;;  %v1371_v48 = vmax.f32 %v1339_v35, 0.0 }
 0x2de   : > { %v1334_v47 = vadd.f32 %v1859_v6, %v1333_v46  ;;  %v1369_v2 = vmax.f32 %v1331_v43, 0.0 }
 0x2df   : > { %v1372_v51 = vmax.f32 %v1342_v45, 0.0 }
 0x2e0   : > { %v1370_v15 = vmax.f32 %v1334_v47, 0.0 }
 0x2e1   : > { %v1382_v52 = vpack.c.bf16 %v1372_v51, %v1371_v48 }
 0x2e2   : > { %v1381_v53 = vpack.c.bf16 %v1370_v15, %v1369_v2  ;;  %v2085_v54 = vpop.f32.mrb[28].mxu1 }
 0x2e3   : > { %v1355_v20 = vadd.f32 %v2085_v54, %v1859_v6  ;;  %v1346_v55 = vpop.f32.mrb[29].mxu1 }
 0x2e4   : > { %v1347_v56 = vadd.f32 %v1859_v6, %v1346_v55  ;;  %v2086_v25 = vpop.f32.mrb[30].mxu1  ;;  %2111 = vmatprep.mubr.bf16.mxu1 %v1381_v53 }
 0x2e5   : > { %v1358_v63 = vadd.f32 %v2086_v25, %v1859_v6  ;;  %v1349_v57 = vpop.f32.mrb[31].mxu1  ;;  %2112 = vmatmul.mubr.bf16.vlgmr.msra.gmra.mrb[32].mxu1 %v1382_v52  ;;  %v1375_v3 = vmax.f32 %v1355_v20, 0.0 }
 0x2e6   : > { %v1350_v58 = vadd.f32 %v1859_v6, %v1349_v57  ;;  %v1373_v23 = vmax.f32 %v1347_v56, 0.0 }
 0x2e7   : > { %v1376_v14 = vmax.f32 %v1358_v63, 0.0 }
 0x2e8   : > { %v1374_v49 = vmax.f32 %v1350_v58, 0.0 }
 0x2e9   : > { %v1384_v32 = vpack.c.bf16 %v1376_v14, %v1375_v3 }
 0x2ea   : > { %v1383_v60 = vpack.c.bf16 %v1374_v49, %v1373_v23 }
 0x2ec   : > { %2115 = vmatprep.mubr.bf16.mxu1 %v1383_v60 }
 0x2ed   : > { %2116 = vmatmul.mubr.bf16.gmra.mrb[36].mxu1 %v1384_v32 }
 0x3a7   : > { %v2105_v4 = vpop.f32.mrb[32].mxu0 }
 0x3a8   : > { %v1499_v62 = vadd.f32 %v2105_v4, %v2749_v61  ;;  %v1490_v0 = vpop.f32.mrb[33].mxu0 }
 0x3a9   : > { %v1491_v9 = vadd.f32 %v2749_v61, %v1490_v0  ;;  %v2106_v11 = vpop.f32.mrb[34].mxu0 }
 0x3aa   : > { %v1555_v5 = vsub.f32 0.0, %v1499_v62  ;;  %v1502_v6 = vadd.f32 %v2106_v11, %v2749_v61  ;;  %v1493_v59 = vpop.f32.mrb[35].mxu0 }
 0x3ab   : > { %v1553_v10 = vsub.f32 0.0, %v1491_v9  ;;  %v1494_v12 = vadd.f32 %v2749_v61, %v1493_v59 }
 0x3ac   : > { %v1573_v13 = vmul.f32 1.442695, %v1555_v5  ;;  %v1556_v16 = vsub.f32 0.0, %v1502_v6 }
 0x3ad   : > { %v1569_v17 = vmul.f32 1.442695, %v1553_v10  ;;  %v1554_v18 = vsub.f32 0.0, %v1494_v12 }
 0x3ae   : > { %2215 = vpow2.f32 %v1573_v13  ;;  %v1575_v19 = vmul.f32 1.442695, %v1556_v16 }
 0x3af   : > { %2217 = vpow2.f32 %v1569_v17  ;;  %v1571_v21 = vmul.f32 1.442695, %v1554_v18  ;;  %v2109_v22 = vpop.f32.mrb[36].mxu0 }
 0x3b0   : > { %2219 = vpow2.f32 %v1575_v19  ;;  %v1515_v24 = vadd.f32 %v2109_v22, %v2749_v61  ;;  %v1506_v26 = vpop.f32.mrb[37].mxu0 }
 0x3b1   : > { %2221 = vpow2.f32 %v1571_v21  ;;  %v1507_v27 = vadd.f32 %v2749_v61, %v1506_v26  ;;  %v2110_v28 = vpop.f32.mrb[38].mxu0 }
 0x3b2   : > { %v1559_v29 = vsub.f32 0.0, %v1515_v24  ;;  %v1518_v30 = vadd.f32 %v2110_v28, %v2749_v61  ;;  %v1509_v31 = vpop.f32.mrb[39].mxu0 }
 0x3b3   : > { %v1557_v7 = vsub.f32 0.0, %v1507_v27  ;;  %v1510_v8 = vadd.f32 %v2749_v61, %v1509_v31 }
 0x3b4   : > { %v1581_v33 = vmul.f32 1.442695, %v1559_v29  ;;  %v1560_v34 = vsub.f32 0.0, %v1518_v30 }
 0x3b5   : > { %v1577_v39 = vmul.f32 1.442695, %v1557_v7  ;;  %v1558_v36 = vsub.f32 0.0, %v1510_v8 }
 0x3b6   : > { %2223 = vpow2.f32 %v1581_v33  ;;  %v1583_v1 = vmul.f32 1.442695, %v1560_v34 }
 0x3b7   : > { %2225 = vpow2.f32 %v1577_v39  ;;  %v1579_v37 = vmul.f32 1.442695, %v1558_v36 }
 0x3b8   : > { %v2113_v38 = vpop.f32.mrb[32].mxu1  ;;  %v2216_v40 = vpop.eup %2215  ;;  %2227 = vpow2.f32 %v1583_v1 }
 0x3b9   : > { %v1531_v41 = vadd.f32 %v2113_v38, %v2749_v61  ;;  %v1522_v42 = vpop.f32.mrb[33].mxu1  ;;  %v2218_v35 = vpop.eup %2217  ;;  %v1603_v44 = vadd.f32 1.0, %v2216_v40  ;;  %2229 = vpow2.f32 %v1579_v37 }
 0x3ba   : > { %v1523_v43 = vadd.f32 %v2749_v61, %v1522_v42  ;;  %v2114_v50 = vpop.f32.mrb[34].mxu1  ;;  %v2220_v45 = vpop.eup %2219  ;;  %v1601_v46 = vadd.f32 1.0, %v2218_v35 }
 0x3bb   : > { %v1563_v47 = vsub.f32 0.0, %v1531_v41  ;;  %v1534_v48 = vadd.f32 %v2114_v50, %v2749_v61  ;;  %v1525_v51 = vpop.f32.mrb[35].mxu1  ;;  %v2222_v2 = vpop.eup %2221  ;;  %2231 = vrcp.f32 %v1603_v44  ;;  %v1604_v15 = vadd.f32 1.0, %v2220_v45 }
 0x3bc   : > { %v1561_v52 = vsub.f32 0.0, %v1523_v43  ;;  %v1526_v53 = vadd.f32 %v2749_v61, %v1525_v51  ;;  %2233 = vrcp.f32 %v1601_v46  ;;  %v1602_v54 = vadd.f32 1.0, %v2222_v2 }
 0x3bd   : > { %v1589_v20 = vmul.f32 1.442695, %v1563_v47  ;;  %v1564_v55 = vsub.f32 0.0, %v1534_v48  ;;  %2235 = vrcp.f32 %v1604_v15 }
 0x3be   : > { %v1585_v56 = vmul.f32 1.442695, %v1561_v52  ;;  %v1562_v25 = vsub.f32 0.0, %v1526_v53  ;;  %2237 = vrcp.f32 %v1602_v54 }
 0x3bf   : > { %v1591_v63 = vmul.f32 1.442695, %v1564_v55  ;;  %2239 = vpow2.f32 %v1589_v20 }
 0x3c0   : > { %v1587_v57 = vmul.f32 1.442695, %v1562_v25  ;;  %v2117_v58 = vpop.f32.mrb[36].mxu1  ;;  %v2224_v3 = vpop.eup %2223  ;;  %2241 = vpow2.f32 %v1585_v56 }
 0x3c1   : > { %v1547_v14 = vadd.f32 %v2117_v58, %v2749_v61  ;;  %v1538_v23 = vpop.f32.mrb[37].mxu1  ;;  %v2226_v49 = vpop.eup %2225  ;;  %v1607_v32 = vadd.f32 1.0, %v2224_v3  ;;  %2243 = vpow2.f32 %v1591_v63 }
 0x3c2   : > { %v1539_v60 = vadd.f32 %v2749_v61, %v1538_v23  ;;  %v2118_v4 = vpop.f32.mrb[38].mxu1  ;;  %v2228_v62 = vpop.eup %2227  ;;  %v1605_v0 = vadd.f32 1.0, %v2226_v49  ;;  %2245 = vpow2.f32 %v1587_v57 }
 0x3c3   : > { %v1567_v9 = vsub.f32 0.0, %v1547_v14  ;;  %v1550_v11 = vadd.f32 %v2118_v4, %v2749_v61  ;;  %v1541_v5 = vpop.f32.mrb[39].mxu1  ;;  %v2230_v6 = vpop.eup %2229  ;;  %2247 = vrcp.f32 %v1607_v32  ;;  %v1608_v59 = vadd.f32 1.0, %v2228_v62 }
 0x3c4   : > { %v1565_v10 = vsub.f32 0.0, %v1539_v60  ;;  %v1542_v12 = vadd.f32 %v2749_v61, %v1541_v5  ;;  %2249 = vrcp.f32 %v1605_v0  ;;  %v1606_v13 = vadd.f32 1.0, %v2230_v6 }
 0x3c5   : > { %v1597_v16 = vmul.f32 1.442695, %v1567_v9  ;;  %v1568_v17 = vsub.f32 0.0, %v1550_v11  ;;  %v2232_v18 = vpop.eup %2231  ;;  %2251 = vrcp.f32 %v1608_v59 }
 0x3c6   : > { %v1593_v19 = vmul.f32 1.442695, %v1565_v10  ;;  %v1566_v21 = vsub.f32 0.0, %v1542_v12  ;;  %v2234_v22 = vpop.eup %2233  ;;  %1635 = vst [vmem:[%s2770_s24 + $0x10] sm:$0xff] %v2232_v18  ;;  %2253 = vrcp.f32 %v1606_v13 }
 0x3c7   : > { %v1599_v24 = vmul.f32 1.442695, %v1568_v17  ;;  %v2236_v26 = vpop.eup %2235  ;;  %1633 = vst [vmem:[%s2770_s24] sm:$0xff] %v2234_v22  ;;  %2255 = vpow2.f32 %v1597_v16 }
 0x3c8   : > { %v1595_v27 = vmul.f32 1.442695, %v1566_v21  ;;  %v2238_v28 = vpop.eup %2237  ;;  %1636 = vst [vmem:[%s2770_s24 + $0x18] sm:$0xff] %v2236_v26  ;;  %2257 = vpow2.f32 %v1593_v19 }
 0x3c9   : > { %v2240_v61 = vpop.eup %2239  ;;  %1634 = vst [vmem:[%s2770_s24 + $0x8] sm:$0xff] %v2238_v28  ;;  %2259 = vpow2.f32 %v1599_v24 }
 0x3ca   : > { %v2242_v29 = vpop.eup %2241  ;;  %v1611_v30 = vadd.f32 1.0, %v2240_v61  ;;  %2261 = vpow2.f32 %v1595_v27 }
 0x3cb   : > { %v2244_v31 = vpop.eup %2243  ;;  %v1609_v7 = vadd.f32 1.0, %v2242_v29 }
 0x3cc   : > { %v2246_v8 = vpop.eup %2245  ;;  %2263 = vrcp.f32 %v1611_v30  ;;  %v1612_v33 = vadd.f32 1.0, %v2244_v31 }
 0x3cd   : > { %v2248_v34 = vpop.eup %2247  ;;  %2265 = vrcp.f32 %v1609_v7  ;;  %v1610_v39 = vadd.f32 1.0, %v2246_v8 }
 0x3ce   : > { %v2250_v36 = vpop.eup %2249  ;;  %1639 = vst [vmem:[%s2770_s24 + $0x30] sm:$0xff] %v2248_v34  ;;  %2267 = vrcp.f32 %v1612_v33 }
 0x3cf   : > { %v2252_v1 = vpop.eup %2251  ;;  %1637 = vst [vmem:[%s2770_s24 + $0x20] sm:$0xff] %v2250_v36  ;;  %2269 = vrcp.f32 %v1610_v39 }
 0x3d0   : > { %v2254_v37 = vpop.eup %2253  ;;  %1640 = vst [vmem:[%s2770_s24 + $0x38] sm:$0xff] %v2252_v1 }
 0x3d1   : > { %v2256_v38 = vpop.eup %2255  ;;  %1638 = vst [vmem:[%s2770_s24 + $0x28] sm:$0xff] %v2254_v37 }
 0x3d2   : > { %v2258_v40 = vpop.eup %2257  ;;  %v1615_v41 = vadd.f32 1.0, %v2256_v38 }
 0x3d3   : > { %v2260_v42 = vpop.eup %2259  ;;  %v1613_v35 = vadd.f32 1.0, %v2258_v40 }
 0x3d4   : > { %v2262_v44 = vpop.eup %2261  ;;  %2271 = vrcp.f32 %v1615_v41  ;;  %v1616_v43 = vadd.f32 1.0, %v2260_v42 }
 0x3d5   : > { %2273 = vrcp.f32 %v1613_v35  ;;  %v1614_v50 = vadd.f32 1.0, %v2262_v44 }
 0x3d6   : > { %v2264_v45 = vpop.eup %2263  ;;  %2275 = vrcp.f32 %v1616_v43 }
 0x3d7   : > { %v2266_v46 = vpop.eup %2265  ;;  %1643 = vst [vmem:[%s2770_s24 + $0x50] sm:$0xff] %v2264_v45  ;;  %2277 = vrcp.f32 %v1614_v50 }
 0x3d8   : > { %v2268_v47 = vpop.eup %2267  ;;  %1641 = vst [vmem:[%s2770_s24 + $0x40] sm:$0xff] %v2266_v46 }
 0x3d9   : > { %v2270_v48 = vpop.eup %2269  ;;  %1644 = vst [vmem:[%s2770_s24 + $0x58] sm:$0xff] %v2268_v47 }
 0x3da   : > { %1642 = vst [vmem:[%s2770_s24 + $0x48] sm:$0xff] %v2270_v48 }
 0x3de   : > { %v2272_v51 = vpop.eup %2271 }
 0x3df   : > { %v2274_v2 = vpop.eup %2273  ;;  %1647 = vst [vmem:[%s2770_s24 + $0x70] sm:$0xff] %v2272_v51 }
 0x3e0   : > { %v2276_v15 = vpop.eup %2275  ;;  %1645 = vst [vmem:[%s2770_s24 + $0x60] sm:$0xff] %v2274_v2 }
 0x3e1   : > { %v2278_v52 = vpop.eup %2277  ;;  %1648 = vst [vmem:[%s2770_s24 + $0x78] sm:$0xff] %v2276_v15 }
 0x3e2   : > { %1646 = vst [vmem:[%s2770_s24 + $0x68] sm:$0xff] %v2278_v52 }
 0x3e3 PF: > { %s25_s29 = sadd.s32 1, %s2285_s29  }
 0x3e4   : > { %p22_p4 = scmp.ge.s32.totalorder %s25_s29, 6  }
 0x3e6   :  { %24 = sbr.rel (!%p22_p4) target bundleno = 1 (0x1), region = 125 }

</bundles_post_ra>
